<compile_context>
chip_gen: v7x
topology: tpu7x:2x2x1
jax: 0.10.0
libtpu: 0.0.40
codegen_flags: <defaults>
</compile_context>

<pallas_src>
import functools

import numpy as np
import jax
import jax.numpy as jnp
from jax.experimental import pallas as pl
from jax.experimental.pallas import tpu as pltpu


def _round_up(x, m):
    return ((x + m - 1) // m) * m


def _vmem_capacity_bytes():
    try:
        return int(pltpu.get_tpu_info().vmem_capacity_bytes)
    except Exception:
        return 64 * 1024 * 1024  # conservative (v7x-sized) fallback


def _lda_kernel(x_ref, wt_ref, b_ref, o_ref, *, tk, n_genes, resident,
                mask_tail, mxu_bf16):
    # x_ref : (TB, TK)          tile of cells x genes (edge tiles partial)
    # wt_ref: (g_pad, C_pad)    resident weight slab   [resident=True]
    #         (TK,    C_pad)    K-streamed weight tile [resident=False]
    # b_ref : (1, C_pad)        zero-padded intercept row (constant block)
    # o_ref : (TB, C_pad)       f32 output tile, resident across the K axis
    k = pl.program_id(1)

    @pl.when(k == 0)
    def _init():
        # Bias folded into the init: added exactly once per row tile.
        o_ref[...] = jnp.broadcast_to(b_ref[...], o_ref.shape)

    x = x_ref[...]
    if mask_tail:
        # Zero-mask gene columns >= G (the K-tail of the last tile holds
        # unspecified data; 0 * zero-padded-weight-row is then exact).
        col = jax.lax.broadcasted_iota(jnp.int32, x.shape, dimension=1)
        x = jnp.where(col + k * tk < n_genes, x, jnp.zeros_like(x))

    if resident:
        off = pl.multiple_of(k * tk, tk)
        w = wt_ref[pl.ds(off, tk), :]
    else:
        w = wt_ref[...]

    if mxu_bf16:
        # In-kernel cast only (no extra HBM traffic); f32 accumulate below.
        x = x.astype(jnp.bfloat16)
        w = w.astype(jnp.bfloat16)

    o_ref[...] += jnp.dot(x, w, preferred_element_type=jnp.float32)


def lda_build_weights(coef, intercept, cell_types, total_cell_types,
                      dtype=jnp.float32):
    """Scatter fitted (coef, intercept) into lane-dense zero-padded slabs.

    Hoist/cache the result across repeated scoring calls.
    coef: (C, G), intercept: (C,), cell_types: (C,) int indices.
    Returns wt: (G, C_pad) and b: (1, C_pad) with C_pad a multiple of 128.
    """
    C, G = coef.shape
    cell_types = jnp.asarray(cell_types, jnp.int32)
    assert intercept.shape == (C,), "intercept must be (n_cell_types,)"
    assert cell_types.shape == (C,), "cell_types must be (n_cell_types,)"
    try:  # cheap host-side sanity check when indices are concrete
        ct = np.asarray(cell_types)
        assert ct.min() >= 0 and ct.max() < total_cell_types, \
            "cell_types out of range"
        assert len(np.unique(ct)) == C, "duplicate cell_types"
    except Exception:
        pass  # traced indices: skip the eager check

    c_pad = _round_up(max(total_cell_types, 1), 128)
    wt = (jnp.zeros((G, c_pad), dtype)
          .at[:, cell_types].set(coef.T.astype(dtype)))
    b = (jnp.zeros((1, c_pad), jnp.float32)
         .at[0, cell_types].set(intercept.astype(jnp.float32)))
    return wt, b


def lda_forward_scored(X, wt, b, total_cell_types, *, block_n=2048,
                       block_k=4096, mxu_bf16=False, weights_resident=None):
    """Score X against pre-built (wt, b) slabs. Returns (N, total_cell_types) f32."""
    N, G = X.shape
    Gw, c_pad = wt.shape
    assert Gw == G, "weight slab gene dim must match X"
    assert c_pad % 128 == 0 and c_pad >= total_cell_types

    # Keep X in its storage dtype: no full-array pad/astype passes over X.
    if not jnp.issubdtype(X.dtype, jnp.floating):
        X = X.astype(jnp.float32)  # e.g. integer count matrices
    if wt.dtype != X.dtype:
        wt = wt.astype(X.dtype)    # small (G, C_pad) cast only
    itm = X.dtype.itemsize

    # Per-generation VMEM budget (~46 MiB on v7x, ~92 MiB on v5e/v6e).
    cap = _vmem_capacity_bytes()
    budget = int(cap * 0.72)

    g128 = _round_up(G, 128)
    tb = min(_round_up(block_n, 8), _round_up(N, 8))
    tk = min(_round_up(block_k, 128), g128)
    resident = True if weights_resident is None else bool(weights_resident)

    def vmem_use(tb_, tk_, res_):
        g_pad_ = _round_up(g128, tk_)
        wt_cost = 2 * (g_pad_ if res_ else tk_) * c_pad * itm
        return (2 * tb_ * tk_ * itm        # X tile, double-buffered
                + wt_cost                  # weight slab / K tiles
                + 2 * 8 * c_pad * 4        # bias row (tile-padded)
                + 2 * tb_ * c_pad * 4)     # resident f32 output tile

    while vmem_use(tb, tk, resident) > budget:
        if (weights_resident is None and resident
                and 2 * _round_up(g128, tk) * c_pad * itm > (budget * 5) // 8):
            resident = False               # slab too big to keep resident
        elif tk > 1024:
            tk = _round_up(tk // 2, 128)
        elif tb > 512:
            tb = _round_up(tb // 2, 8)
        elif tk > 128:
            tk = _round_up(tk // 2, 128)
        elif tb > 8:
            tb = _round_up(tb // 2, 8)
        else:
            break

    # Megacore (v7x): make sure the parallel N axis has >= 2 tiles when possible.
    if pl.cdiv(N, tb) < 2 and N > 8:
        tb = _round_up(pl.cdiv(N, 2), 8)

    num_i = pl.cdiv(N, tb)
    num_k = pl.cdiv(G, tk)
    g_pad = num_k * tk

    # Pad only the (small) weight slab so in-kernel K slices stay in range;
    # X is never copied or padded.
    if g_pad != G:
        wt = jnp.pad(wt, ((0, g_pad - G), (0, 0)))

    kernel = functools.partial(
        _lda_kernel, tk=tk, n_genes=G, resident=resident,
        mask_tail=(G % tk != 0), mxu_bf16=bool(mxu_bf16))

    wt_spec = (pl.BlockSpec((g_pad, c_pad), lambda i, k: (0, 0)) if resident
               else pl.BlockSpec((tk, c_pad), lambda i, k: (k, 0)))

    cost = pl.CostEstimate(
        flops=2 * N * G * c_pad,
        transcendentals=0,
        bytes_accessed=(N * G * itm
                        + g_pad * c_pad * itm * (1 if resident else num_i)
                        + N * c_pad * 4),
    )

    vmem_limit = int(min(cap * 0.9,
                         max(vmem_use(tb, tk, resident) * 1.5,
                             32 * 1024 * 1024)))

    out = pl.pallas_call(
        kernel,
        out_shape=jax.ShapeDtypeStruct((N, c_pad), jnp.float32),
        grid_spec=pltpu.PrefetchScalarGridSpec(
            num_scalar_prefetch=0,
            grid=(num_i, num_k),
            in_specs=[
                pl.BlockSpec((tb, tk), lambda i, k: (i, k)),     # X tile
                wt_spec,                                         # weights
                pl.BlockSpec((1, c_pad), lambda i, k: (0, 0)),   # bias row
            ],
            out_specs=pl.BlockSpec((tb, c_pad), lambda i, k: (i, 0)),
        ),
        compiler_params=pltpu.CompilerParams(
            dimension_semantics=("parallel", "arbitrary"),
            vmem_limit_bytes=vmem_limit,
        ),
        cost_estimate=cost,
    )(X, wt, b)

    # Drop the padded cell-type columns (rows were never padded).
    return out[:, :total_cell_types]


def lda_forward(X, coef, intercept, cell_types, total_cell_types, **kwargs):
    """Convenience wrapper: build weight slabs (hoistable) then score X."""
    dt = X.dtype if jnp.issubdtype(X.dtype, jnp.floating) else jnp.float32
    wt, b = lda_build_weights(coef, intercept, cell_types, total_cell_types,
                              dtype=dt)
    return lda_forward_scored(X, wt, b, total_cell_types, **kwargs)


def lda_forward_ref(X, coef, intercept, cell_types, total_cell_types):
    """Pure-JAX reference mirroring the PyTorch forward exactly."""
    out = jnp.zeros((X.shape[0], total_cell_types), jnp.float32)
    scores = (X.astype(jnp.float32) @ coef.T.astype(jnp.float32)
              + intercept.astype(jnp.float32))
    return out.at[:, cell_types].set(scores)


if __name__ == "__main__":
    key = jax.random.PRNGKey(0)
    k_x, k_c, k_i = jax.random.split(key, 3)

    # Small synthetic shapes consistent with LDA.forward; deliberately ragged
    # (N not a multiple of 8, G not a multiple of 128) to exercise the
    # partial-block and gene-tail-mask paths.
    N = 13                # number of cells (batch)
    G = 200               # number of genes (features)
    C = 6                 # number of fitted cell types
    TOTAL = 10            # total_cell_types

    X = jax.random.normal(k_x, (N, G), dtype=jnp.float32)
    coef = 0.05 * jax.random.normal(k_c, (C, G), dtype=jnp.float32)
    intercept = 0.1 * jax.random.normal(k_i, (C,), dtype=jnp.float32)
    cell_types = jnp.array([0, 2, 3, 5, 7, 9], dtype=jnp.int32)

    ref = lda_forward_ref(X, coef, intercept, cell_types, TOTAL)

    # 1) Default path (resident weights, single K step at this G).
    out = jax.block_until_ready(lda_forward(X, coef, intercept, cell_types, TOTAL))
    assert out.shape == (N, TOTAL)
    assert jnp.allclose(out, ref, atol=1e-4, rtol=1e-4), "default path mismatch"

    # 2) Multi-K-step accumulation with the resident weight slab (dynamic slice).
    out2 = jax.block_until_ready(
        lda_forward(X, coef, intercept, cell_types, TOTAL, block_k=128))
    assert jnp.allclose(out2, ref, atol=1e-4, rtol=1e-4), "multi-K path mismatch"

    # 3) K-streamed weight fallback path.
    out3 = jax.block_until_ready(
        lda_forward(X, coef, intercept, cell_types, TOTAL, block_k=128,
                    weights_resident=False))
    assert jnp.allclose(out3, ref, atol=1e-4, rtol=1e-4), "streamed-wt path mismatch"

    # 4) Opt-in in-kernel bf16 MXU path (v5e helper); looser tolerance.
    out4 = jax.block_until_ready(
        lda_forward(X, coef, intercept, cell_types, TOTAL, mxu_bf16=True))
    assert jnp.allclose(out4, ref, atol=5e-2, rtol=5e-2), "bf16 MXU path mismatch"

    # TODO(synk): LDA.fit (covariance estimation + lstsq) and pred/pred_prob's
    # argmax/softmax are left to plain JAX/linalg; only the forward scoring
    # hot path is a Pallas kernel.
    print("KERNEL_OK")
</pallas_src>

<mosaic_0001>
module attributes {stable_mosaic.version = 11 : i64} {
  func.func @_lda_kernel(%arg0: i32, %arg1: i32, %arg2: memref<8x256xf32, #tpu.memory_space<vmem>>, %arg3: memref<256x128xf32, #tpu.memory_space<vmem>>, %arg4: memref<1x128xf32, #tpu.memory_space<vmem>>, %arg5: memref<8x128xf32, #tpu.memory_space<vmem>>) attributes {dimension_semantics = [#tpu.dimension_semantics<parallel>, #tpu.dimension_semantics<arbitrary>], iteration_bounds = array<i64: 2, 1>, scalar_prefetch = 0 : i64, scratch_operands = 0 : i64, tpu.core_type = #tpu.core_type<tc>, window_params = [{transform_indices = @transform_0, window_bounds = array<i64: 8, 256>}, {pipeline_mode = #tpu.pipeline_mode<synchronous>, transform_indices = @transform_1, window_bounds = array<i64: 256, 128>}, {pipeline_mode = #tpu.pipeline_mode<synchronous>, transform_indices = @transform_2, window_bounds = array<i64: 1, 128>}, {transform_indices = @transform_3, window_bounds = array<i64: 8, 128>}]} {
    %c0_i32 = arith.constant 0 : i32
    %0 = arith.cmpi eq, %arg1, %c0_i32 : i32
    %1 = arith.extui %0 : i1 to i32
    %c0_i32_0 = arith.constant 0 : i32
    %2 = arith.cmpi ne, %1, %c0_i32_0 : i32
    scf.if %2 {
      %c0_9 = arith.constant 0 : index
      %c0_10 = arith.constant 0 : index
      %20 = vector.load %arg4[%c0_9, %c0_10] : memref<1x128xf32, #tpu.memory_space<vmem>>, vector<1x128xf32>
      %21 = vector.shape_cast %20 : vector<1x128xf32> to vector<1x128xf32>
      %22 = vector.broadcast %21 : vector<1x128xf32> to vector<8x128xf32>
      %c0_11 = arith.constant 0 : index
      %c0_12 = arith.constant 0 : index
      %23 = vector.load %arg5[%c0_11, %c0_12] : memref<8x128xf32, #tpu.memory_space<vmem>>, vector<8x128xf32>
      tpu.vector_store %arg5[%c0_11, %c0_12], %22 {strides = array<i32>} : memref<8x128xf32, #tpu.memory_space<vmem>>, vector<8x128xf32>,
    } else {
    }
    %c0 = arith.constant 0 : index
    %c0_1 = arith.constant 0 : index
    %3 = vector.load %arg2[%c0, %c0_1] : memref<8x256xf32, #tpu.memory_space<vmem>>, vector<8x256xf32>
    %4 = tpu.iota {dimensions = array<i32: 1>} : vector<8x256xi32>
    %c256_i32 = arith.constant 256 : i32
    %5 = arith.muli %arg1, %c256_i32 : i32
    %6 = vector.broadcast %5 : i32 to vector<8x256xi32>
    %7 = arith.addi %4, %6 : vector<8x256xi32>
    %c200_i32 = arith.constant 200 : i32
    %8 = vector.broadcast %c200_i32 : i32 to vector<8x256xi32>
    %9 = arith.cmpi slt, %7, %8 : vector<8x256xi32>
    %cst = arith.constant 0.000000e+00 : f32
    %10 = vector.broadcast %cst : f32 to vector<8x256xf32>
    %11 = arith.select %9, %3, %10 : vector<8x256xi1>, vector<8x256xf32>
    %c256_i32_2 = arith.constant 256 : i32
    %12 = arith.muli %arg1, %c256_i32_2 : i32
    %13 = tpu.assume_multiple %12, 256 : i32
    %14 = arith.index_cast %13 : i32 to index
    %c0_3 = arith.constant 0 : index
    %15 = vector.load %arg3[%14, %c0_3] : memref<256x128xf32, #tpu.memory_space<vmem>>, vector<256x128xf32>
    %c0_4 = arith.constant 0 : index
    %c0_5 = arith.constant 0 : index
    %16 = vector.load %arg5[%c0_4, %c0_5] : memref<8x128xf32, #tpu.memory_space<vmem>>, vector<8x128xf32>
    %cst_6 = arith.constant dense<0.000000e+00> : vector<8x128xf32>
    %17 = tpu.matmul %11, %15, %cst_6 {dimension_numbers = #tpu.dot_dimension_numbers<[1], [0], [0], [1], [0, 0, 1, 1], [], []>} : vector<8x256xf32>, vector<256x128xf32>, vector<8x128xf32> -> vector<8x128xf32>
    %18 = arith.addf %16, %17 : vector<8x128xf32>
    %c0_7 = arith.constant 0 : index
    %c0_8 = arith.constant 0 : index
    %19 = vector.load %arg5[%c0_7, %c0_8] : memref<8x128xf32, #tpu.memory_space<vmem>>, vector<8x128xf32>
    tpu.vector_store %arg5[%c0_7, %c0_8], %18 {strides = array<i32>} : memref<8x128xf32, #tpu.memory_space<vmem>>, vector<8x128xf32>,
    return
  }
  func.func @transform_0(%arg0: i32, %arg1: i32) -> (i32, i32) {
    %c0_i32 = arith.constant 0 : i32
    return %arg0, %arg1 : i32, i32
  }
  func.func @transform_1(%arg0: i32, %arg1: i32) -> (i32, i32) {
    %c0_i32 = arith.constant 0 : i32
    %c0_i32_0 = arith.constant 0 : i32
    %c0_i32_1 = arith.constant 0 : i32
    return %c0_i32, %c0_i32_0 : i32, i32
  }
  func.func @transform_2(%arg0: i32, %arg1: i32) -> (i32, i32) {
    %c0_i32 = arith.constant 0 : i32
    %c0_i32_0 = arith.constant 0 : i32
    %c0_i32_1 = arith.constant 0 : i32
    return %c0_i32, %c0_i32_0 : i32, i32
  }
  func.func @transform_3(%arg0: i32, %arg1: i32) -> (i32, i32) {
    %c0_i32 = arith.constant 0 : i32
    %c0_i32_0 = arith.constant 0 : i32
    return %arg0, %c0_i32 : i32, i32
  }
}

</mosaic_0001>

<bundles_post_ra>
// kernel: tpu_custom_call.1
= control target key start
LH: loop header
LB: loop body
LE: loop exit
PB: predicated region body
PF: predicated region fallthrough
CT: control target
= control target key end

     0   :  { %8 = vsyncpa [#allocation3], 0  ;;  %s1011_s0 = inlined_call_operand.hbm [shape: f32[13,200], index: 0, kind: input, shape index: {}]   ;;  %s1012_s1 = inlined_call_operand.hbm [shape: f32[256,128], index: 1, kind: input, shape index: {}]   ;;  %s1013_s2 = inlined_call_operand.vmem [shape: f32[1,128], index: 2, kind: input, shape index: {}]   ;;  %s1014_s3 = inlined_call_operand.hbm [shape: f32[13,128], index: 3, kind: output, shape index: {}]  }
   0x1   :  { %10 = vsyncpa [#allocation3 + $0x1], 0 }
   0x2   :  { %11 = vsyncpa [#allocation6], 0 }
   0x3   :  { %12 = vsyncpa [#allocation4], 0 }
   0x4   :  { %14 = vsyncpa [#allocation4 + $0x1], 0  ;;  %s789_s12 = smov 0   ;;  %s791_s13 = smov 0  }
   0x5   :  { %s793_s14 = smov 0   ;;  %s795_s15 = smov 0  }
   0x6   :  { %s797_s16 = smov 0   ;;  %s799_s17 = smov 0  }
   0x7 LB: > { %s457_s18 = sadd.s32 4294967295, %s762_s17   ;;  %s458_s19 = sadd.s32 4294967294, %s762_s17   ;;  %s762_s17 = sphi %s799_s17, %s20_s17   ;;  %s758_s16 = sphi %s797_s16, %s1038_s16   ;;  %s754_s15 = sphi %s795_s15, %s1037_s15   ;;  %s750_s14 = sphi %s793_s14, %s1036_s14   ;;  %s746_s13 = sphi %s791_s13, %s1035_s13   ;;  %s742_s12 = sphi %s789_s12, %s1034_s12  }
   0x8   : > { %p54_p0 = scmp.ne.s32.totalorder %s746_s13, %s742_s12  ;;  %p823_p1 = scmp.eq.s32.totalorder %s457_s18, 0 }
   0x9   : > { %p827_p2 = scmp.eq.s32.totalorder %s457_s18, 1  ;;  %p126_p3 = scmp.eq.s32.totalorder %s458_s19, 1 }
   0xa   : > { %s1019_s20 = scalar_select %p823_p1, 1, 0 }
   0xb   : > { %s1020_s21 = scalar_select %p827_p2, 1, 0 }
   0xc   : > { %p833_p4 = por %p823_p1, %p54_p0  ;;  %p459_p5 = scmp.ge.s32.totalorder %s762_s17, 1 }
   0xd   : > { %p838_p6 = por %p126_p3, %p54_p0  ;;  %p133_p7 = scmp.lt.s32.totalorder %s762_s17, 3 }
   0xe   : > { %s1021_s22 = scalar_select %p833_p4, 1, 0 }
   0xf   : > { %s1022_s23 = scalar_select %p838_p6, 1, 0 }
  0x10   : > { %p843_p8 = pnand %p459_p5, %p133_p7  ;;  %s764_s25 = smov [#allocation5]  }
  0x11   : > { %s145_s26 = sshll.u32 %s764_s25, 4  ;;  %s32_s28 = sadd.s32 1, %s758_s16  ;;  %s146_s26 = int_to_ptr.vmem [resolvable:$true] %s145_s26 }
  0x12   : > { %s1023_s24 = scalar_select %p843_p8, 1, 0 }
  0x13   : > { %p551_p9 = pneg %p843_p8  ;;  %s618_s4 = scalar_lea.hbm %s1012_s1, 4096 }
  0x14   : > { %p619_p12 = scmp.ne.s32.totalorder %s1012_s1, %s618_s4  ;;  %p625_p5 = scmp.lt.u32.totalorder %s618_s4, %s1012_s1 }
  0x15   : > { %p852_p11 = pnand %p551_p9, %p823_p1 }
  0x17   : > { %p620_p13 = pneg %p852_p11 }
  0x19   : > { %p621_p0 = pnand %p620_p13, %p619_p12 }
  0x1b   : > { %p622_p3 = pneg %p621_p0 }
  0x1d   : > { %p627_p7 = pnand %p625_p5, %p622_p3 }
  0x1f   : > { %630 = shalt.err (!%p627_p7)
}
  0x20   : > { %s631_s9 = scalar_lea.vmem %s146_s26, 4096  ;;  %p639_p1 = scmp.lt.s32.totalorder %s146_s26, %s146_s26 }
  0x21   : > { %p632_p9 = scmp.ne.s32.totalorder %s146_s26, %s631_s9  ;;  %p640_p4 = scmp.lt.s32.totalorder %s631_s9, %s631_s9 }
  0x23   : > { %p634_p10 = pnand %p632_p9, %p620_p13  ;;  %p641_p8 = por %p640_p4, %p639_p1 }
  0x25   : > { %p635_p6 = pneg %p634_p10 }
  0x27   : > { %p642_p2 = pnand %p641_p8, %p635_p6 }
  0x29   : > { %645 = shalt.err (!%p642_p2)
}
  0x2a   : > { %s765_s10 = smov 128   ;;  %s766_s11 = smov 8  }
  0x2b   : > { %554 = dma.hbm_to_vmem [thread:$0]  (!%p852_p11), %s1012_s1, 4096, %s146_s26, [#allocation6], %s765_s10, %s765_s10, %s766_s11  }
  0x2c   : > { %p34_p1 = scmp.ge.s32.totalorder %s32_s28, 2  ;;  %s41_s25 = sadd.s32 1, %s750_s14 }
  0x2d   : > { %p48_p2 = scmp.ne.s32.totalorder %s750_s14, %s746_s13  ;;  %p49_p4 = scmp.eq.s32.totalorder %s762_s17, 0 }
  0x2e   : > { %s1040_s28 = smov (%p34_p1, %s32_s28), 0  ;;  %p1026_p8 = scmp.ne.s32.totalorder %s1020_s21, 0 }
  0x2f   : > { %p879_p6 = por %p49_p4, %p48_p2  ;;  %s36_s27 = ssub.s32 %s758_s16, %s1040_s28 }
  0x30   : > { %p885_p10 = por %p1026_p8, %p48_p2  ;;  %p564_p12 = scmp.lt.s32.totalorder %s762_s17, 2 }
  0x31   : > { %p39_p11 = scmp.eq.s32.totalorder %s36_s27, 0  ;;  %s162_s26 = sand.u32 1, %s750_s14  }
  0x32   : > { %s462_s4 = sshll.u32 %s162_s26, 4  ;;  %s475_s6 = sshll.u32 %s758_s16, 8 }
  0x33   : > { %s894_s5 = scalar_select %p39_p11, %s750_s14, %s41_s25  }
  0x34   : > { %s900_s9 = scalar_lea.hbm %s1011_s0, %s475_s6  ;;  %s166_s21 = scalar_lea.vmem [#allocation2], %s462_s4 }
  0x35   : > { %s176_s10 = sshll.u32 %s166_s21, 4  ;;  %p906_p13 = pnand %p564_p12, %p879_p6  ;;  %s902_s10 = int_to_ptr.vmem [resolvable:$true] %s176_s10 }
  0x36   : > { %s163_s18 = scalar_lea.sflag [#allocation3], %s162_s26  ;;  %s646_s19 = scalar_lea.hbm %s900_s9, 256 }
  0x37   : > { %p647_p0 = scmp.ne.s32.totalorder %s900_s9, %s646_s19  ;;  %p648_p3 = pneg %p906_p13 }
  0x38   : > { %s651_s4 = scalar_lea.hbm %s1011_s0, 512  ;;  %p652_p9 = scmp.lt.u32.totalorder %s900_s9, %s1011_s0 }
  0x39   : > { %p649_p5 = pnand %p648_p3, %p647_p0  ;;  %p653_p1 = scmp.lt.u32.totalorder %s651_s4, %s646_s19 }
  0x3a   : > { %p655_p4 = scmp.lt.u32.totalorder %s646_s19, %s900_s9 }
  0x3b   : > { %p650_p7 = pneg %p649_p5  ;;  %p654_p2 = por %p653_p1, %p652_p9 }
  0x3d   : > { %p656_p6 = por %p655_p4, %p654_p2 }
  0x3f   : > { %p657_p8 = pnand %p656_p6, %p650_p7 }
  0x41   : > { %660 = shalt.err (!%p657_p8)
}
  0x42   : > { %s661_s26 = scalar_lea.vmem %s902_s10, 256  ;;  %s767_s7 = smov [#allocation2]  }
  0x43   : > { %p662_p12 = scmp.ne.s32.totalorder %s902_s10, %s661_s26  ;;  %s666_s8 = sshll.u32 %s767_s7, 4  ;;  %s667_s8 = int_to_ptr.vmem [resolvable:$false] %s666_s8 }
  0x44   : > { %s668_s21 = scalar_lea.vmem %s667_s8, 512  ;;  %p669_p5 = scmp.lt.s32.totalorder %s902_s10, %s667_s8 }
  0x45   : > { %p664_p11 = pnand %p662_p12, %p648_p3  ;;  %p670_p9 = scmp.lt.s32.totalorder %s668_s21, %s661_s26 }
  0x47   : > { %p665_p0 = pneg %p664_p11  ;;  %p671_p1 = por %p670_p9, %p669_p5 }
  0x49   : > { %p672_p2 = pnand %p671_p1, %p665_p0 }
  0x4b   : > { %675 = shalt.err (!%p672_p2)
}
  0x4c   : > { %558 = dma.hbm_to_vmem [thread:$0]  (!%p906_p13), %s900_s9, 256, %s902_s10, %s163_s18  }
  0x4d   : > { %p1029_p7 = scmp.ne.s32.totalorder %s1023_s24, 0 }
  0x4e   : > { %s938_s19 = sand.u32 (!%p1029_p7), 1, %s746_s13   ;;  %p1030_p3 = scmp.ne.s32.totalorder (!%p1029_p7), %s1021_s22, 0 }
  0x4f   : > { %185 = sbr.rel (%p1029_p7) target bundleno = 356 (0x164), region = 32  ;;  %s466_s25 = sshll.u32 (!%p1029_p7), %s938_s19, 4 }
  0x50   : > { %s188_s27 = scalar_lea.sflag (!%p1029_p7), [#allocation3], %s938_s19  ;;  %s942_s4 = scalar_lea.vmem (!%p1029_p7), [#allocation2], %s466_s25 }
  0x56   : > { %729 = dma.done.wait (%p1030_p3), %s188_s27, 256  }
  0x57   : > { %731 = vsyncadd (%p1030_p3), %s188_s27, 4294967040  ;;  %p1031_p13 = scmp.ne.s32.totalorder %s1019_s20, 0 }
  0x59   : > { %733 = dma.done.wait (%p1031_p13), [#allocation6], 4096  }
  0x5a   : > { %735 = vsyncadd (%p1031_p13), [#allocation6], 4294963200  ;;  %v233_v0 = vlaneseq  ;;  %v261_v1 = vld [vmem:[#allocation5 + $0x80] sm:$0xff]  ;;  %v262_v2 = vld [vmem:[#allocation5 + $0x88] sm:$0xff]  ;;  %s468_s20 = sshll.u32 %s938_s19, 3  ;;  %s472_s9 = sshll.u32 %s754_s15, 7 }
  0x5b   : > { %v245_v3 = vld [vmem:[#allocation5] sm:$0xff]  ;;  %v511_v5 = vpack.c.bf16 %v262_v2, %v261_v1  ;;  %v246_v6 = vld [vmem:[#allocation5 + $0x8] sm:$0xff]  ;;  %v263_v7 = vld [vmem:[#allocation5 + $0x90] sm:$0xff]  ;;  %s217_s10 = scalar_lea.vmem [#allocation7], %s468_s20  ;;  %s962_s6 = scalar_lea.hbm %s1014_s3, %s472_s9 }
  0x5c   : > { %v234_v4 = vand.u32 127, %v233_v0  ;;  %v264_v8 = vld [vmem:[#allocation5 + $0x98] sm:$0xff]  ;;  %v513_v9 = vpack.c.bf16 %v246_v6, %v245_v3  ;;  %v247_v11 = vld [vmem:[#allocation5 + $0x10] sm:$0xff]  ;;  %v265_v13 = vld [vmem:[#allocation5 + $0xa0] sm:$0xff]  ;;  %s364_s11 = sshll.u32 %s217_s10, 4  ;;  %s351_s26 = scalar_lea.sflag [#allocation4], %s938_s19  ;;  %s964_s11 = int_to_ptr.vmem [resolvable:$true] %s364_s11 }
  0x5d   : > { %v515_v10 = vpack.c.bf16 %v264_v8, %v263_v7  ;;  %v248_v12 = vld [vmem:[#allocation5 + $0x18] sm:$0xff]  ;;  %512 = vmatprep.subr.bf16.mxu0 %v511_v5  ;;  %v266_v14 = vld [vmem:[#allocation5 + $0xa8] sm:$0xff]  ;;  %v249_v18 = vld [vmem:[#allocation5 + $0x20] sm:$0xff]  ;;  %s676_s7 = scalar_lea.vmem %s964_s11, 128  ;;  %s768_s15 = smov [#allocation7]  }
  0x5e   : > { %514 = vmatpush3.bf16.msra.mxu0 %v513_v9  ;;  %v517_v15 = vpack.c.bf16 %v248_v12, %v247_v11  ;;  %v235_v16 = vadd.s32 128, %v234_v4  ;;  %v519_v17 = vpack.c.bf16 %v266_v14, %v265_v13  ;;  %v250_v19 = vld [vmem:[#allocation5 + $0x28] sm:$0xff]  ;;  %v267_v20 = vld [vmem:[#allocation5 + $0xb0] sm:$0xff]  ;;  %v268_v21 = vld [vmem:[#allocation5 + $0xb8] sm:$0xff]  ;;  %p677_p4 = scmp.ne.s32.totalorder %s964_s11, %s676_s7  ;;  %s680_s8 = sshll.u32 %s768_s15, 4  ;;  %s681_s8 = int_to_ptr.vmem [resolvable:$false] %s680_s8 }
  0x5f   : > { %516 = vmatprep.subr.bf16.mxu0 %v515_v10  ;;  %v521_v22 = vpack.c.bf16 %v250_v19, %v249_v18  ;;  %v523_v23 = vpack.c.bf16 %v268_v21, %v267_v20  ;;  %v251_v24 = vld [vmem:[#allocation5 + $0x30] sm:$0xff]  ;;  %v252_v25 = vld [vmem:[#allocation5 + $0x38] sm:$0xff]  ;;  %v269_v26 = vld [vmem:[#allocation5 + $0xc0] sm:$0xff]  ;;  %s682_s21 = scalar_lea.vmem %s681_s8, 256  ;;  %p683_p12 = scmp.lt.s32.totalorder %s964_s11, %s681_s8 }
  0x60   : > { %vm241_vm0 = vcmp.lt.s32.totalorder %v235_v16, 200  ;;  %v270_v27 = vld [vmem:[#allocation5 + $0xc8] sm:$0xff]  ;;  %v525_v29 = vpack.c.bf16 %v252_v25, %v251_v24  ;;  %v253_v31 = vld [vmem:[#allocation5 + $0x40] sm:$0xff]  ;;  %v271_v33 = vld [vmem:[#allocation5 + $0xd0] sm:$0xff]  ;;  %p678_p6 = pnand %p677_p4, %p885_p10  ;;  %p684_p11 = scmp.lt.s32.totalorder %s682_s21, %s676_s7 }
  0x61   : > { %v232_v28 = vld [vmem:[%s942_s4 + $0x8] sm:$0xff]  ;;  %v527_v30 = vpack.c.bf16 %v270_v27, %v269_v26  ;;  %v255_v37 = vld [vmem:[#allocation5 + $0x50] sm:$0xff]  ;;  %v273_v39 = vld [vmem:[#allocation5 + $0xe0] sm:$0xff] }
  0x62   : > { %518 = vmatpush3.bf16.msra.mxu0 %v517_v15  ;;  %470 = vmatprep.mubr.msk.f32.mxu0 %vm241_vm0, %v232_v28  ;;  %v254_v32 = vld [vmem:[#allocation5 + $0x48] sm:$0xff]  ;;  %v272_v34 = vld [vmem:[#allocation5 + $0xd8] sm:$0xff]  ;;  %v257_v43 = vld [vmem:[#allocation5 + $0x60] sm:$0xff]  ;;  %p679_p8 = pneg %p678_p6  ;;  %p685_p0 = por %p684_p11, %p683_p12 }
  0x63   : > { %520 = vmatprep.subr.bf16.mxu0 %v519_v17  ;;  %v529_v35 = vpack.c.bf16 %v254_v32, %v253_v31  ;;  %v531_v36 = vpack.c.bf16 %v272_v34, %v271_v33  ;;  %v256_v38 = vld [vmem:[#allocation5 + $0x58] sm:$0xff]  ;;  %v274_v40 = vld [vmem:[#allocation5 + $0xe8] sm:$0xff]  ;;  %v275_v45 = vld [vmem:[#allocation5 + $0xf0] sm:$0xff] }
  0x64   : > { %v533_v41 = vpack.c.bf16 %v256_v38, %v255_v37  ;;  %v535_v42 = vpack.c.bf16 %v274_v40, %v273_v39  ;;  %v258_v44 = vld [vmem:[#allocation5 + $0x68] sm:$0xff]  ;;  %v276_v46 = vld [vmem:[#allocation5 + $0xf8] sm:$0xff]  ;;  %v259_v49 = vld [vmem:[#allocation5 + $0x70] sm:$0xff]  ;;  %p686_p5 = pnand %p685_p0, %p679_p8 }
  0x65   : > { %v537_v47 = vpack.c.bf16 %v258_v44, %v257_v43  ;;  %v539_v48 = vpack.c.bf16 %v276_v46, %v275_v45  ;;  %v260_v50 = vld [vmem:[#allocation5 + $0x78] sm:$0xff]  ;;  %v231_v52 = vld [vmem:[%s942_s4] sm:$0xff] }
  0x66   : > { %522 = vmatpush3.bf16.msra.mxu0 %v521_v22  ;;  %v541_v51 = vpack.c.bf16 %v260_v50, %v259_v49  ;;  %v469_v54 = vld [vmem:[%s1013_s2] ss:$0 sm:$0xff] }
  0x67   : > { %524 = vmatprep.subr.bf16.mxu0 %v523_v23 }
  0x6a   : > { %526 = vmatpush3.bf16.msra.mxu0 %v525_v29 }
  0x6b   : > { %528 = vmatprep.subr.bf16.mxu0 %v527_v30 }
  0x6e   : > { %530 = vmatpush3.bf16.msra.mxu0 %v529_v35 }
  0x6f   : > { %532 = vmatprep.subr.bf16.mxu0 %v531_v36 }
  0x72   : > { %534 = vmatpush3.bf16.msra.mxu0 %v533_v41 }
  0x73   : > { %536 = vmatprep.subr.bf16.mxu0 %v535_v42 }
  0x76   : > { %538 = vmatpush3.bf16.msra.mxu0 %v537_v47 }
  0x77   : > { %540 = vmatprep.subr.bf16.mxu0 %v539_v48 }
  0x7a   : > { %542 = vmatpush3.bf16.msra.mxu0 %v541_v51 }
  0x7d   : > { %343 = vmatmul.mubr.f32.vlgmr.msra.gmra.mrb[0].mxu0 %v231_v52 }
 0x150   : > { %v508_v53 = vpop.f32.mrb[0].mxu0 }
 0x151   : > { %v509_v55 = vpop.f32.mrb[1].mxu0 }
 0x152   : > { %v510_v56 = vadd.f32 %v509_v55, %v508_v53 }
 0x154   : > { %v348_v57 = vadd.f32 %v510_v56, %v469_v54 }
 0x156   : > { %349 = vst [vmem:[%s217_s10] sm:$0xff] %v348_v57 }
 0x157   : > { %689 = shalt.err (!%p686_p5)
}
 0x158   : > { %s690_s19 = scalar_lea.hbm %s962_s6, 128  ;;  %s694_s4 = scalar_lea.hbm %s1014_s3, 256 }
 0x159   : > { %p691_p9 = scmp.ne.s32.totalorder %s962_s6, %s690_s19  ;;  %p695_p7 = scmp.lt.u32.totalorder %s962_s6, %s1014_s3 }
 0x15a   : > { %p696_p3 = scmp.lt.u32.totalorder %s694_s4, %s690_s19  ;;  %p698_p4 = scmp.lt.u32.totalorder %s690_s19, %s962_s6 }
 0x15b   : > { %p692_p1 = pnand %p691_p9, %p885_p10 }
 0x15c   : > { %p697_p13 = por %p696_p3, %p695_p7 }
 0x15d   : > { %p693_p2 = pneg %p692_p1 }
 0x15e   : > { %p699_p6 = por %p698_p4, %p697_p13 }
 0x160   : > { %p700_p8 = pnand %p699_p6, %p693_p2 }
 0x162   : > { %703 = shalt.err (!%p700_p8)
}
 0x163   : > { %549 = dma.vmem_to_hbm [thread:$0]  (%p885_p10), %s964_s11, 128, %s962_s6, %s351_s26  }
 0x164 PF: > { %s376_s24 = sand.u32 1, %s742_s12   ;;  %p1032_p12 = scmp.ne.s32.totalorder %s1022_s23, 0 }
 0x165   : > { %p1033_p11 = scmp.ge.s32.totalorder %s762_s17, 2  ;;  %s377_s9 = scalar_lea.sflag [#allocation4], %s376_s24 }
 0x167   : > { %p560_p0 = pnand %p1033_p11, %p1032_p12 }
 0x169   : > { %737 = dma.done.wait (!%p560_p0), %s377_s9, 128  }
 0x16a   : > { %739 = vsyncadd (!%p560_p0), %s377_s9, 4294967168  ;;  %s20_s17 = sadd.s32 1, %s762_s17   ;;  %s1034_s12 = smov %s746_s13 }
 0x16b   : > { %p17_p5 = scmp.ge.s32.totalorder %s20_s17, 4   ;;  %s1035_s13 = smov %s750_s14 }
 0x16c   : > { %s1036_s14 = smov %s894_s5  ;;  %s1037_s15 = smov %s758_s16 }
 0x16d   : > { %s1038_s16 = smov %s1040_s28  ;;  %19 = sbr.rel (!%p17_p5) target bundleno = 7 (0x7), region = 86 }
 0x174   :  { %382 = vsyncpa [#allocation3], 1 }
 0x175   :  { %384 = vsyncpa [#allocation3 + $0x1], 1 }
 0x176   :  { %385 = vsyncpa [#allocation6], 1 }
 0x177   :  { %386 = vsyncpa [#allocation4], 1 }
 0x178   :  { %388 = vsyncpa [#allocation4 + $0x1], 1 }

</bundles_post_ra>
